<compile_context>
chip_gen: v6e
topology: v6e:2x2x1
jax: 0.10.0
libtpu: 0.0.40
codegen_flags: <defaults>
</compile_context>

<pallas_src>
import functools

import jax
import jax.numpy as jnp
from jax.experimental import pallas as pl
from jax.experimental.pallas import tpu as pltpu


def _cdiv(a, b):
    return -(-a // b)


def _round_up(a, b):
    return _cdiv(a, b) * b


def _vmem_capacity_bytes():
    """Physical VMEM per TensorCore (128 MiB on v5e/v6e, 64 MiB on v7x)."""
    try:
        return int(pltpu.get_tpu_info().vmem_capacity_bytes)
    except Exception:
        return 64 * 1024 * 1024  # conservative (v7x-sized) fallback


def _layernorm_kernel(x_ref, w_ref, b_ref, o_ref, *, d_model, epsilon):
    # x_ref: (block_rows, d_model); w_ref / b_ref: (1, d_model).
    x = x_ref[...].astype(jnp.float32)
    w = w_ref[...].astype(jnp.float32)   # loaded/cast once per tile, reused below
    b = b_ref[...].astype(jnp.float32)

    # One pass over the tile: Σx and Σx² together. The two reductions do not
    # serially depend on a subtracted xc tile, and no full-tile xc temp exists.
    s1 = jnp.sum(x, axis=-1, keepdims=True)
    s2 = jnp.sum(x * x, axis=-1, keepdims=True)
    mean = s1 * jnp.float32(1.0 / d_model)
    # Unbiased (ddof=1) variance, matching torch.Tensor.std().
    # TODO(synk): E[x^2]-mean^2 can lose precision when |mean| >> std; switch
    # back to the two-pass (x - mean) form if such inputs matter.
    var = (s2 - mean * s1) * jnp.float32(1.0 / (d_model - 1))
    var = jnp.maximum(var, jnp.float32(0.0))  # guard cancellation-induced negatives
    std = jnp.sqrt(var)
    # Column-only reciprocal (block_rows, 1): negligible cost; approx=False
    # keeps the result close to the reference's true divide. Flip approx=True
    # to push it onto the EUP if a few low-order bits of drift are acceptable.
    inv = pl.reciprocal(std + jnp.float32(epsilon), approx=False)

    y = (x - mean) * inv * w + b
    o_ref[...] = y.astype(o_ref.dtype)


def _choose_block_rows(rows, d_model, itemsize, sublane, tile_budget_bytes,
                       min_grid_steps=8, traffic_target_bytes=8 * 1024 * 1024):
    """Pick the row-tile size.

    Constraints, in priority order:
      1. fit the VMEM tile budget (double-buffered in/out tiles + ~4 f32
         full-tile temporaries in the body),
      2. keep >= min_grid_steps grid steps so megacore sharding and BlockSpec
         double-buffering both have work (>= ~4 steps per v7x TensorCore),
      3. otherwise make each step move ~traffic_target_bytes of HBM traffic so
         the ~0.35 us per-step overhead is amortized.
    """
    per_row_bytes = d_model * (4 * itemsize + 16)   # 2x in + 2x out + f32 temps
    vmem_rows = max(sublane, tile_budget_bytes // per_row_bytes)
    traffic_rows = max(sublane, traffic_target_bytes // (2 * d_model * itemsize))
    steps_rows = max(sublane, _round_up(_cdiv(rows, min_grid_steps), sublane))

    br = min(traffic_rows, vmem_rows, steps_rows)
    br = min(br, _round_up(rows, sublane))          # never bigger than the slab
    br = max(sublane, (br // sublane) * sublane)
    return br


def layer_norm(x, w_ln, b_ln, epsilon=0.0001, use_ln=True, block_rows=None):
    """x: (..., d_model). Returns LayerNorm(x) with the module's exact semantics."""
    if not use_ln:
        return x

    d_model = x.shape[-1]
    if d_model < 2:
        raise ValueError("unbiased std (ddof=1) requires d_model >= 2")

    orig_shape = x.shape
    x2 = x.reshape(-1, d_model)
    rows = x2.shape[0]

    itemsize = jnp.dtype(x.dtype).itemsize
    # Sublane packing: f32 -> 8 rows/vreg, bf16 -> 16, int8/fp8 -> 32.
    sublane = 8 if itemsize >= 4 else (16 if itemsize == 2 else 32)

    vmem_cap = _vmem_capacity_bytes()
    if vmem_cap >= 96 * 1024 * 1024:
        # v5e / v6e: 128 MiB physical VMEM — use most of it.
        tile_budget = 64 * 1024 * 1024
        vmem_limit = 100 * 1024 * 1024
    else:
        # v7x: 64 MiB physical VMEM per TensorCore — leave real headroom.
        tile_budget = 24 * 1024 * 1024
        vmem_limit = 48 * 1024 * 1024

    if block_rows is None:
        block_rows = _choose_block_rows(rows, d_model, itemsize, sublane, tile_budget)
    block_rows = max(sublane, (int(block_rows) // sublane) * sublane)

    # No padding: the partial last block (if any) is handled by Pallas masked
    # boundary loads/stores; rows are independent so tail garbage is harmless.
    grid = _cdiv(rows, block_rows)

    w2 = w_ln.reshape(1, d_model)
    b2 = b_ln.reshape(1, d_model)

    # TODO(synk): d_model < 128 (or not a multiple of 128) wastes lanes and
    # produces masked partial stores; tiny feature dims are better left to XLA.

    kernel = functools.partial(_layernorm_kernel, d_model=d_model, epsilon=epsilon)

    out = pl.pallas_call(
        kernel,
        out_shape=jax.ShapeDtypeStruct((rows, d_model), x.dtype),
        grid_spec=pltpu.PrefetchScalarGridSpec(
            num_scalar_prefetch=0,
            grid=(grid,),
            in_specs=[
                pl.BlockSpec((block_rows, d_model), lambda i: (i, 0)),
                pl.BlockSpec((1, d_model), lambda i: (0, 0)),  # resident across steps
                pl.BlockSpec((1, d_model), lambda i: (0, 0)),
            ],
            out_specs=pl.BlockSpec((block_rows, d_model), lambda i: (i, 0)),
        ),
        compiler_params=pltpu.CompilerParams(
            dimension_semantics=("parallel",),
            vmem_limit_bytes=vmem_limit,
        ),
    )(x2, w2, b2)

    return out.reshape(orig_shape)


if __name__ == "__main__":
    batch, seq, d_model = 2, 8, 128   # small, lane-dense demo shape
    epsilon = 0.0001

    key = jax.random.PRNGKey(0)
    x = jax.random.normal(key, (batch, seq, d_model), dtype=jnp.float32)

    # Deterministic parameter init, exactly as in the module's __init__.
    w_ln = jnp.ones((d_model,), dtype=jnp.float32)
    b_ln = jnp.zeros((d_model,), dtype=jnp.float32)

    def ref_ln(xx):
        mean = jnp.mean(xx, axis=-1, keepdims=True)
        xc = xx - mean
        std = jnp.sqrt(jnp.sum(xc * xc, axis=-1, keepdims=True) / (d_model - 1))
        return xc / (std + epsilon) * w_ln + b_ln

    y = jax.block_until_ready(layer_norm(x, w_ln, b_ln, epsilon=epsilon, use_ln=True))
    assert jnp.allclose(y, ref_ln(x), atol=2e-5, rtol=2e-5), "mismatch vs reference"

    # Ragged row count (3*7 = 21 rows): exercises the unpadded partial-last-block path.
    x_odd = jax.random.normal(jax.random.PRNGKey(1), (3, 7, d_model), jnp.float32)
    y_odd = jax.block_until_ready(layer_norm(x_odd, w_ln, b_ln, epsilon=epsilon))
    assert jnp.allclose(y_odd, ref_ln(x_odd), atol=2e-5, rtol=2e-5), "mismatch (ragged rows)"

    print("KERNEL_OK")
</pallas_src>

<mosaic_0001>
module attributes {stable_mosaic.version = 11 : i64} {
  func.func @_layernorm_kernel(%arg0: i32, %arg1: memref<8x128xf32, #tpu.memory_space<vmem>>, %arg2: memref<1x128xf32, #tpu.memory_space<vmem>>, %arg3: memref<1x128xf32, #tpu.memory_space<vmem>>, %arg4: memref<8x128xf32, #tpu.memory_space<vmem>>) attributes {dimension_semantics = [#tpu.dimension_semantics<parallel>], iteration_bounds = array<i64: 2>, scalar_prefetch = 0 : i64, scratch_operands = 0 : i64, tpu.core_type = #tpu.core_type<tc>, window_params = [{transform_indices = @transform_0, window_bounds = array<i64: 8, 128>}, {pipeline_mode = #tpu.pipeline_mode<synchronous>, transform_indices = @transform_1, window_bounds = array<i64: 1, 128>}, {pipeline_mode = #tpu.pipeline_mode<synchronous>, transform_indices = @transform_2, window_bounds = array<i64: 1, 128>}, {transform_indices = @transform_3, window_bounds = array<i64: 8, 128>}]} {
    %c0 = arith.constant 0 : index
    %c0_0 = arith.constant 0 : index
    %0 = vector.load %arg1[%c0, %c0_0] : memref<8x128xf32, #tpu.memory_space<vmem>>, vector<8x128xf32>
    %c0_1 = arith.constant 0 : index
    %c0_2 = arith.constant 0 : index
    %1 = vector.load %arg2[%c0_1, %c0_2] : memref<1x128xf32, #tpu.memory_space<vmem>>, vector<1x128xf32>
    %c0_3 = arith.constant 0 : index
    %c0_4 = arith.constant 0 : index
    %2 = vector.load %arg3[%c0_3, %c0_4] : memref<1x128xf32, #tpu.memory_space<vmem>>, vector<1x128xf32>
    %cst = arith.constant dense<0.000000e+00> : vector<8xf32>
    %3 = vector.multi_reduction <add>, %0, %cst [1] : vector<8x128xf32> to vector<8xf32>
    %4 = vector.shape_cast %3 : vector<8xf32> to vector<8x1xf32>
    %5 = arith.mulf %0, %0 : vector<8x128xf32>
    %cst_5 = arith.constant dense<0.000000e+00> : vector<8xf32>
    %6 = vector.multi_reduction <add>, %5, %cst_5 [1] : vector<8x128xf32> to vector<8xf32>
    %7 = vector.shape_cast %6 : vector<8xf32> to vector<8x1xf32>
    %cst_6 = arith.constant 7.812500e-03 : f32
    %8 = vector.broadcast %cst_6 : f32 to vector<8x1xf32>
    %9 = arith.mulf %4, %8 : vector<8x1xf32>
    %10 = arith.mulf %9, %4 : vector<8x1xf32>
    %11 = arith.subf %7, %10 : vector<8x1xf32>
    %cst_7 = arith.constant 0.00787401571 : f32
    %12 = vector.broadcast %cst_7 : f32 to vector<8x1xf32>
    %13 = arith.mulf %11, %12 : vector<8x1xf32>
    %cst_8 = arith.constant 0.000000e+00 : f32
    %14 = vector.broadcast %cst_8 : f32 to vector<8x1xf32>
    %15 = arith.maximumf %13, %14 : vector<8x1xf32>
    %16 = math.sqrt %15 : vector<8x1xf32>
    %cst_9 = arith.constant 9.99999974E-5 : f32
    %17 = vector.broadcast %cst_9 : f32 to vector<8x1xf32>
    %18 = arith.addf %16, %17 : vector<8x1xf32>
    %19 = tpu.reciprocal %18 : vector<8x1xf32> -> vector<8x1xf32>
    %20 = vector.broadcast %9 : vector<8x1xf32> to vector<8x128xf32>
    %21 = arith.subf %0, %20 : vector<8x128xf32>
    %22 = vector.broadcast %19 : vector<8x1xf32> to vector<8x128xf32>
    %23 = arith.mulf %21, %22 : vector<8x128xf32>
    %24 = vector.broadcast %1 : vector<1x128xf32> to vector<8x128xf32>
    %25 = arith.mulf %23, %24 : vector<8x128xf32>
    %26 = vector.broadcast %2 : vector<1x128xf32> to vector<8x128xf32>
    %27 = arith.addf %25, %26 : vector<8x128xf32>
    %c0_10 = arith.constant 0 : index
    %c0_11 = arith.constant 0 : index
    %28 = vector.load %arg4[%c0_10, %c0_11] : memref<8x128xf32, #tpu.memory_space<vmem>>, vector<8x128xf32>
    tpu.vector_store %arg4[%c0_10, %c0_11], %27 {strides = array<i32>} : memref<8x128xf32, #tpu.memory_space<vmem>>, vector<8x128xf32>,
    return
  }
  func.func @transform_0(%arg0: i32) -> (i32, i32) {
    %c0_i32 = arith.constant 0 : i32
    %c0_i32_0 = arith.constant 0 : i32
    return %arg0, %c0_i32 : i32, i32
  }
  func.func @transform_1(%arg0: i32) -> (i32, i32) {
    %c0_i32 = arith.constant 0 : i32
    %c0_i32_0 = arith.constant 0 : i32
    %c0_i32_1 = arith.constant 0 : i32
    return %c0_i32, %c0_i32_0 : i32, i32
  }
  func.func @transform_2(%arg0: i32) -> (i32, i32) {
    %c0_i32 = arith.constant 0 : i32
    %c0_i32_0 = arith.constant 0 : i32
    %c0_i32_1 = arith.constant 0 : i32
    return %c0_i32, %c0_i32_0 : i32, i32
  }
  func.func @transform_3(%arg0: i32) -> (i32, i32) {
    %c0_i32 = arith.constant 0 : i32
    %c0_i32_0 = arith.constant 0 : i32
    return %arg0, %c0_i32 : i32, i32
  }
}

</mosaic_0001>

<bundles_post_ra>
// kernel: tpu_custom_call.1
= control target key start
LH: loop header
LB: loop body
LE: loop exit
PB: predicated region body
PF: predicated region fallthrough
CT: control target
= control target key end

     0   :  { %8 = vsyncpa [#allocation3], 0  ;;  %s640_s0 = inlined_call_operand.hbm [shape: f32[16,128], index: 0, kind: input, shape index: {}]   ;;  %s641_s1 = inlined_call_operand.vmem [shape: f32[1,128], index: 1, kind: input, shape index: {}]   ;;  %s642_s2 = inlined_call_operand.vmem [shape: f32[1,128], index: 2, kind: input, shape index: {}]   ;;  %s643_s3 = inlined_call_operand.hbm [shape: f32[16,128], index: 3, kind: output, shape index: {}]  }
   0x1   :  { %10 = vsyncpa [#allocation3 + $0x1], 0 }
   0x2   :  { %11 = vsyncpa [#allocation4], 0 }
   0x3   :  { %13 = vsyncpa [#allocation4 + $0x1], 0  ;;  %s489_s12 = smov 0   ;;  %s491_s13 = smov 0  }
   0x4   :  { %s493_s14 = smov 0   ;;  %s495_s15 = smov 0  }
   0x5 LB: > { %s510_s16 = sadd.s32 4294967295, %s465_s15   ;;  %s309_s17 = sadd.s32 4294967294, %s465_s15   ;;  %s465_s15 = sphi %s495_s15, %s660_s15   ;;  %s461_s14 = sphi %s493_s14, %s659_s14   ;;  %s457_s13 = sphi %s491_s13, %s658_s13   ;;  %s453_s12 = sphi %s489_s12, %s657_s12  }
   0x6   : > { %s514_s18 = sadd.s32 1, %s465_s15   ;;  %s26_s19 = sadd.s32 1, %s461_s14 }
   0x7   : > { %s23_s20 = ssub.s32 %s465_s15, %s514_s18  ;;  %p33_p0 = scmp.ne.s32.totalorder %s461_s14, %s457_s13 }
   0x8   : > { %p24_p1 = scmp.eq.s32.totalorder %s23_s20, 0  ;;  %p34_p2 = scmp.eq.s32.totalorder %s465_s15, 0 }
   0x9   : > { %p39_p3 = scmp.ne.s32.totalorder %s457_s13, %s453_s12  ;;  %p40_p4 = scmp.eq.s32.totalorder %s510_s16, 0 }
   0xa   : > { %s526_s21 = scalar_select %p24_p1, %s461_s14, %s26_s19  }
   0xb   : > { %p528_p5 = por %p34_p2, %p33_p0  ;;  %p532_p6 = por %p40_p4, %p39_p3 }
   0xc   : > { %p105_p7 = scmp.eq.s32.totalorder %s510_s16, 1  ;;  %p111_p8 = scmp.eq.s32.totalorder %s309_s17, 1 }
   0xd   : > { %s647_s23 = scalar_select %p532_p6, 1, 0 }
   0xe   : > { %p335_p10 = scmp.lt.s32.totalorder %s465_s15, 2  ;;  %p539_p11 = por %p105_p7, %p33_p0 }
   0xf   : > { %p543_p12 = por %p111_p8, %p39_p3  ;;  %s137_s26 = sand.u32 1, %s461_s14  }
  0x10   : > { %s648_s24 = scalar_select %p539_p11, 1, 0 }
  0x11   : > { %s649_s25 = scalar_select %p543_p12, 1, 0 }
  0x12   : > { %s313_s27 = sshll.u32 %s465_s15, 7  ;;  %s312_s28 = sshll.u32 %s137_s26, 3 }
  0x13   : > { %s552_s4 = scalar_lea.hbm %s640_s0, %s313_s27  ;;  %s141_s5 = scalar_lea.vmem [#allocation2], %s312_s28 }
  0x14   : > { %s148_s6 = sshll.u32 %s141_s5, 4  ;;  %p556_p13 = pnand %p335_p10, %p528_p5  ;;  %s560_s6 = int_to_ptr.vmem [resolvable:$true] %s148_s6 }
  0x15   : > { %s138_s8 = scalar_lea.sflag [#allocation3], %s137_s26  ;;  %s373_s9 = scalar_lea.hbm %s552_s4, 128 }
  0x16   : > { %p374_p2 = scmp.ne.s32.totalorder %s552_s4, %s373_s9  ;;  %p375_p3 = pneg %p556_p13 }
  0x17   : > { %s378_s17 = scalar_lea.hbm %s640_s0, 256  ;;  %p379_p5 = scmp.lt.s32.totalorder %s552_s4, %s640_s0 }
  0x18   : > { %p376_p4 = pnand %p375_p3, %p374_p2  ;;  %p380_p8 = scmp.lt.s32.totalorder %s378_s17, %s373_s9 }
  0x1a   : > { %p377_p7 = pneg %p376_p4  ;;  %p381_p10 = por %p380_p8, %p379_p5 }
  0x1c   : > { %p382_p9 = pnand %p381_p10, %p377_p7 }
  0x1e   : > { %385 = shalt.err (!%p382_p9)
}
  0x1f   : > { %s386_s22 = scalar_lea.vmem %s560_s6, 128  ;;  %s467_s26 = smov [#allocation2]  }
  0x20   : > { %p387_p0 = scmp.ne.s32.totalorder %s560_s6, %s386_s22  ;;  %s391_s27 = sshll.u32 %s467_s26, 4  ;;  %s392_s27 = int_to_ptr.vmem [resolvable:$false] %s391_s27 }
  0x21   : > { %s393_s28 = scalar_lea.vmem %s392_s27, 256  ;;  %p394_p4 = scmp.lt.s32.totalorder %s560_s6, %s392_s27 }
  0x22   : > { %p389_p1 = pnand %p387_p0, %p375_p3  ;;  %p395_p12 = scmp.lt.s32.totalorder %s393_s28, %s386_s22 }
  0x24   : > { %p390_p2 = pneg %p389_p1  ;;  %p396_p11 = por %p395_p12, %p394_p4 }
  0x26   : > { %p397_p6 = pnand %p396_p11, %p390_p2 }
  0x28   : > { %400 = shalt.err (!%p397_p6)
}
  0x29   : > { %330 = dma.hbm_to_vmem [thread:$0]  (!%p556_p13), %s552_s4, 128, %s560_s6, %s138_s8  }
  0x2a   : > { %p651_p9 = scmp.lt.s32.totalorder %s465_s15, 3  ;;  %p652_p7 = scmp.ge.s32.totalorder %s465_s15, 1 }
  0x2c   : > { %p154_p0 = pnand %p652_p7, %p651_p9 }
  0x2d   : > { %s587_s29 = sand.u32 (!%p154_p0), 1, %s457_s13   ;;  %p653_p6 = scmp.ne.s32.totalorder (!%p154_p0), %s647_s23, 0 }
  0x2e   : > { %157 = sbr.rel (%p154_p0) target bundleno = 254 (0xfe), region = 32  ;;  %s315_s30 = sshll.u32 (!%p154_p0), %s587_s29, 3 }
  0x2f   : > { %s160_s5 = scalar_lea.sflag (!%p154_p0), [#allocation3], %s587_s29  ;;  %s163_s7 = scalar_lea.vmem (!%p154_p0), [#allocation2], %s315_s30 }
  0x33   : > { %444 = dma.done.wait (%p653_p6), %s160_s5, 128  }
  0x34   : > { %446 = vsyncadd (%p653_p6), %s160_s5, 4294967168  ;;  %v186_v0 = vld [vmem:[%s163_s7] sm:$0xff]  ;;  %s320_s9 = sshll.u32 %s510_s16, 7  ;;  %s185_s10 = scalar_lea.vmem [#allocation5], %s315_s30 }
  0x35   : > { %189 = vadd.xlane.f32.xlu0 %v186_v0  ;;  %v191_v1 = vmul.f32 %v186_v0, %v186_v0  ;;  %v317_v17 = vld [vmem:[%s641_s1] ss:$0 sm:$0xff]  ;;  %s239_s11 = sshll.u32 %s185_s10, 4  ;;  %s237_s20 = scalar_lea.hbm %s643_s3, %s320_s9  ;;  %s240_s11 = int_to_ptr.vmem [resolvable:$true] %s239_s11 }
  0x36   : > { %v318_v19 = vld [vmem:[%s642_s2] ss:$0 sm:$0xff]  ;;  %s226_s22 = scalar_lea.sflag [#allocation4], %s587_s29  ;;  %s401_s26 = scalar_lea.vmem %s240_s11, 128 }
  0x37   : > { %p402_p11 = scmp.ne.s32.totalorder %s240_s11, %s401_s26  ;;  %p654_p12 = scmp.ne.s32.totalorder %s648_s24, 0 }
  0x38   : > { %s468_s27 = smov [#allocation5]  }
  0x39   : > { %192 = vadd.xlane.f32.xlu0 %v191_v1  ;;  %p403_p13 = pnand %p402_p11, %p654_p12  ;;  %s405_s28 = sshll.u32 %s468_s27, 4  ;;  %s406_s28 = int_to_ptr.vmem [resolvable:$false] %s405_s28 }
  0x3a   : > { %s407_s16 = scalar_lea.vmem %s406_s28, 256  ;;  %p408_p3 = scmp.lt.s32.totalorder %s240_s11, %s406_s28 }
  0x3b   : > { %p404_p1 = pneg %p403_p13  ;;  %p409_p5 = scmp.lt.s32.totalorder %s407_s16, %s401_s26 }
  0x3d   : > { %p410_p8 = por %p409_p5, %p408_p3 }
  0x3f   : > { %p411_p10 = pnand %p410_p8, %p404_p1 }
  0xbe   : > { %v190_v2 = vpop.xlane.xlu0 %189 }
  0xbf   : > { %v194_v3 = vmul.f32 0.0078125, %v190_v2 }
  0xc1   : > { %v195_v4 = vmul.f32 %v194_v3, %v190_v2  ;;  %v208_v15 = vsub.f32 %v186_v0, %v194_v3 }
  0xc2   : > { %v193_v5 = vpop.xlane.xlu0 %192 }
  0xc3   : > { %v196_v6 = vsub.f32 %v193_v5, %v195_v4 }
  0xc5   : > { %v197_v7 = vmul.f32 0.007874016, %v196_v6 }
  0xc7   : > { %v198_v8 = vmax.f32 %v197_v7, 0.0 }
  0xc9   : > { %369 = vrsqrt.f32 %v198_v8  ;;  %vm201_vm0 = vcmp.eq.f32.partialorder %v198_v8, inf  ;;  %v204_v11 = vand.u32 2147483648, %v198_v8  ;;  %vm203_vm1 = vcmp.eq.f32.partialorder %v198_v8, 0.0 }
  0xd6   : > { %v370_v9 = vpop.eup %369 }
  0xd7   : > { %v200_v10 = vmul.f32 %v370_v9, %v198_v8 }
  0xd9   : > { %v202_v12 = vsel %vm201_vm0, %v198_v8, %v200_v10 }
  0xda   : > { %v205_v13 = vsel %vm203_vm1, %v204_v11, %v202_v12 }
  0xdb   : > { %v206_v14 = vadd.f32 0.0001, %v205_v13 }
  0xdd   : > { %371 = vrcp.f32 %v206_v14 }
  0xea   : > { %v372_v16 = vpop.eup %371 }
  0xeb   : > { %v209_v18 = vmul.f32 %v372_v16, %v208_v15 }
  0xed   : > { %v216_v20 = vmul.f32 %v317_v17, %v209_v18 }
  0xef   : > { %v223_v21 = vadd.f32 %v318_v19, %v216_v20 }
  0xf1   : > { %224 = vst [vmem:[%s185_s10] sm:$0xff] %v223_v21 }
  0xf2   : > { %414 = shalt.err (!%p411_p10)
}
  0xf3   : > { %s415_s30 = scalar_lea.hbm %s237_s20, 128  ;;  %s419_s7 = scalar_lea.hbm %s643_s3, 256 }
  0xf4   : > { %p416_p2 = scmp.ne.s32.totalorder %s237_s20, %s415_s30  ;;  %p420_p7 = scmp.lt.s32.totalorder %s237_s20, %s643_s3 }
  0xf5   : > { %p421_p0 = scmp.lt.s32.totalorder %s419_s7, %s415_s30 }
  0xf6   : > { %p417_p4 = pnand %p416_p2, %p654_p12 }
  0xf7   : > { %p422_p6 = por %p421_p0, %p420_p7 }
  0xf8   : > { %p418_p9 = pneg %p417_p4 }
  0xfa   : > { %p423_p11 = pnand %p422_p6, %p418_p9 }
  0xfc   : > { %426 = shalt.err (!%p423_p11)
}
  0xfd   : > { %325 = dma.vmem_to_hbm [thread:$0]  (%p654_p12), %s240_s11, 128, %s237_s20, %s226_s22  }
  0xfe PF: > { %s251_s6 = sand.u32 1, %s453_s12   ;;  %p655_p13 = scmp.ne.s32.totalorder %s649_s25, 0 }
  0xff   : > { %p656_p1 = scmp.ge.s32.totalorder %s465_s15, 2  ;;  %s252_s8 = scalar_lea.sflag [#allocation4], %s251_s6 }
 0x101   : > { %p332_p3 = pnand %p656_p1, %p655_p13 }
 0x103   : > { %p333_p5 = pneg %p332_p3 }
 0x105   : > { %448 = dma.done.wait (%p333_p5), %s252_s8, 128  }
 0x106   : > { %450 = vsyncadd (%p333_p5), %s252_s8, 4294967168  ;;  %p16_p8 = scmp.ge.s32.totalorder %s514_s18, 4   ;;  %s657_s12 = smov %s457_s13 }
 0x107   : > { %s658_s13 = smov %s461_s14  ;;  %s659_s14 = smov %s526_s21 }
 0x108   : > { %s660_s15 = smov %s514_s18  ;;  %18 = sbr.rel (!%p16_p8) target bundleno = 5 (0x5), region = 77 }
 0x10d   :  { %257 = vsyncpa [#allocation3], 1 }
 0x10e   :  { %259 = vsyncpa [#allocation3 + $0x1], 1 }
 0x10f   :  { %260 = vsyncpa [#allocation4], 1 }
 0x110   :  { %262 = vsyncpa [#allocation4 + $0x1], 1 }

</bundles_post_ra>
